<compile_context>
chip_gen: v7x
topology: tpu7x:2x2x1
jax: 0.10.0
libtpu: 0.0.40
codegen_flags: <defaults>
</compile_context>

<pallas_src>
import math

import jax
import jax.numpy as jnp
from jax import lax
from jax.experimental import pallas as pl
from jax.experimental.pallas import tpu as pltpu

# ----------------- config (small, consistent with the module) ----------------
BATCH = 2
SEQ = 8
HIDDEN = 32
NUM_HEADS = 4
NUM_KV_HEADS = 2
HEAD_DIM = HIDDEN // NUM_HEADS                      # 8
KV_GROUPS = NUM_HEADS // NUM_KV_HEADS               # 2
ROPE_THETA = 10000.0
QKV_OUT = (NUM_HEADS + 2 * NUM_KV_HEADS) * HEAD_DIM  # 64
QW = NUM_HEADS * HEAD_DIM                            # 32  (all q heads, lane-dense)
KW = NUM_KV_HEADS * HEAD_DIM                         # 16  (all kv heads, lane-dense)
ROPE_W = 2 * QW + 2 * KW                             # 96  (cos_q | sin_q | cos_k | sin_k)
NEG_INF = -1e30                                      # additive causal-mask value


# ------------------------------ fused kernel ---------------------------------
def _fused_attn_kernel(x_ref, wqkv_ref, wo_ref, rope_ref, rotq_ref, rotk_ref,
                       mask_ref, o_ref, attn_ref):
    """One step: x (M, E) -> o (M, E).  M is either S (per-batch grid) or B*S
    (flattened single step); the mask encodes causality (+ batch blocking)."""
    D = HEAD_DIM
    x = x_ref[...]                                            # (M, E)

    # ---- QKV projection against the de-interleaved weight: cols = [Q | K | V]
    qkv = lax.dot_general(x, wqkv_ref[...], (((1,), (1,)), ((), ())),
                          preferred_element_type=jnp.float32)  # (M, QKV_OUT)
    q = qkv[:, :QW]                                            # (M, H*D)
    k = qkv[:, QW:QW + KW]                                     # (M, KVH*D)
    v = qkv[:, QW + KW:QW + 2 * KW]                            # (M, KVH*D)

    # ---- packed, per-head lane-tiled rotary tables (q copies carry 1/sqrt(D))
    rope = rope_ref[...]                                       # (M, ROPE_W)
    cos_q = rope[:, :QW]
    sin_q = rope[:, QW:2 * QW]
    cos_k = rope[:, 2 * QW:2 * QW + KW]
    sin_k = rope[:, 2 * QW + KW:]

    # ---- RoPE for all heads with ONE block-diagonal rotation matmul per side
    qr = q * cos_q + jnp.dot(q, rotq_ref[...],
                             preferred_element_type=jnp.float32) * sin_q
    kr = k * cos_k + jnp.dot(k, rotk_ref[...],
                             preferred_element_type=jnp.float32) * sin_k

    mask = mask_ref[...]                                       # (M, M), resident

    # ---- per-head attention (heads unrolled at trace time; GQA share of K/V)
    for h in range(NUM_HEADS):
        j = h // KV_GROUPS                   # query head h uses kv head h // G
        qh = qr[:, h * D:(h + 1) * D]                          # (M, D)
        kh = kr[:, j * D:(j + 1) * D]
        vh = v[:, j * D:(j + 1) * D]

        # scores = (q/sqrt(D)) @ k^T + mask   (scale already folded into qr)
        s = lax.dot_general(qh, kh, (((1,), (1,)), ((), ())),
                            preferred_element_type=jnp.float32) + mask

        # softmax in fp32 (exact divide; approx reciprocal was flagged)
        m = jnp.max(s, axis=-1, keepdims=True)
        p = jnp.exp(s - m)
        p = p / jnp.sum(p, axis=-1, keepdims=True)

        # write head output into the lane-dense slab at its static lane offset
        attn_ref[:, h * D:(h + 1) * D] = jnp.dot(
            p, vh, preferred_element_type=jnp.float32)

    # ---- single output projection: attn_slab @ wo.T
    o_ref[...] = lax.dot_general(attn_ref[...], wo_ref[...],
                                 (((1,), (1,)), ((), ())),
                                 preferred_element_type=jnp.float32)


# --------------------------- chip-aware grid choice ---------------------------
def _prefer_flat_batch():
    """True on single-TensorCore chips (v5e / v6e): collapse the batch grid
    into one kernel step.  False (keep a 2-wide 'parallel' batch axis) on
    v7x / megacore / unknown chips so the second TensorCore is used."""
    try:
        kind = jax.local_devices()[0].device_kind.lower()
    except Exception:
        return False
    return any(t in kind for t in ("v5 lite", "v5e", "v6 lite", "v6e"))


# ------------------------------ full forward ----------------------------------
def internlm2_attention_forward(hidden_states, position_ids, wqkv, wo,
                                flatten_batch=None):
    B, S, E = hidden_states.shape
    if flatten_batch is None:
        flatten_batch = _prefer_flat_batch()
    num_steps = 1 if flatten_batch else B
    M = (B * S) // num_steps

    # ---- de-interleave wqkv rows: '(kvh gs d)' packing -> [Q heads | K | V]
    perm = []
    for kvh in range(NUM_KV_HEADS):                   # q head order = kvh*G + g
        for g in range(KV_GROUPS):
            base = (kvh * (2 + KV_GROUPS) + g) * HEAD_DIM
            perm += list(range(base, base + HEAD_DIM))
    for gs in (KV_GROUPS, KV_GROUPS + 1):             # then K rows, then V rows
        for kvh in range(NUM_KV_HEADS):
            base = (kvh * (2 + KV_GROUPS) + gs) * HEAD_DIM
            perm += list(range(base, base + HEAD_DIM))
    wqkv_perm = wqkv[jnp.asarray(perm, dtype=jnp.int32), :]    # (QKV_OUT, E)

    # ---- rotary tables (InternLM2RotaryEmbedding), lane-tiled per head,
    #      1/sqrt(D) pre-folded into the query copies, packed into one input.
    inv_freq = 1.0 / (ROPE_THETA ** (
        jnp.arange(0, HEAD_DIM, 2, dtype=jnp.float32) / HEAD_DIM))
    freqs = position_ids.astype(jnp.float32)[..., None] * inv_freq  # (B,S,D/2)
    emb = jnp.concatenate([freqs, freqs], axis=-1)                  # (B,S,D)
    cos = jnp.cos(emb)
    sin = jnp.sin(emb)
    scale = 1.0 / math.sqrt(HEAD_DIM)
    rope = jnp.concatenate([
        jnp.tile(cos * scale, (1, 1, NUM_HEADS)),
        jnp.tile(sin * scale, (1, 1, NUM_HEADS)),
        jnp.tile(cos, (1, 1, NUM_KV_HEADS)),
        jnp.tile(sin, (1, 1, NUM_KV_HEADS)),
    ], axis=-1).reshape(B * S, ROPE_W)                              # (B*S, 96)

    # ---- block-diagonal rotate_half matrices (signed permutation per head)
    half = HEAD_DIM // 2
    r = jnp.arange(HEAD_DIM)[:, None]
    c = jnp.arange(HEAD_DIM)[None, :]
    rot_block = (jnp.where(c - r == half, 1.0, 0.0)
                 - jnp.where(r - c == half, 1.0, 0.0)).astype(jnp.float32)
    rotq = jnp.kron(jnp.eye(NUM_HEADS, dtype=jnp.float32), rot_block)      # (QW, QW)
    rotk = jnp.kron(jnp.eye(NUM_KV_HEADS, dtype=jnp.float32), rot_block)   # (KW, KW)

    # ---- causal mask (block-diagonal over batch when the grid is collapsed)
    idx = jnp.arange(M)
    if flatten_batch:
        same_b = (idx[:, None] // S) == (idx[None, :] // S)
        caus = (idx[None, :] % S) <= (idx[:, None] % S)
        mask = jnp.where(same_b & caus, 0.0, NEG_INF).astype(jnp.float32)
    else:
        mask = jnp.where(idx[None, :] <= idx[:, None], 0.0,
                         NEG_INF).astype(jnp.float32)

    x2d = hidden_states.reshape(B * S, E)

    out = pl.pallas_call(
        _fused_attn_kernel,
        out_shape=jax.ShapeDtypeStruct((B * S, E), jnp.float32),
        grid=(num_steps,),
        in_specs=[
            pl.BlockSpec((M, E), lambda i: (i, 0)),              # x rows for step
            pl.BlockSpec((QKV_OUT, E), lambda i: (0, 0)),        # wqkv (deint.), resident
            pl.BlockSpec((E, QW), lambda i: (0, 0)),             # wo, resident
            pl.BlockSpec((M, ROPE_W), lambda i: (i, 0)),         # packed rope tables
            pl.BlockSpec((QW, QW), lambda i: (0, 0)),            # rotq, resident
            pl.BlockSpec((KW, KW), lambda i: (0, 0)),            # rotk, resident
            pl.BlockSpec((M, M), lambda i: (0, 0)),              # mask, resident
        ],
        out_specs=pl.BlockSpec((M, E), lambda i: (i, 0)),
        scratch_shapes=[pltpu.VMEM((M, QW), jnp.float32)],       # lane-dense attn slab
        compiler_params=pltpu.CompilerParams(
            dimension_semantics=("parallel",)),
    )(x2d, wqkv_perm, wo, rope, rotq, rotk, mask)
    return out.reshape(B, S, E)


# ----------------------------- pure-JAX reference -----------------------------
def reference_forward(hidden_states, position_ids, wqkv, wo):
    B, S, E = hidden_states.shape
    qkv = hidden_states @ wqkv.T
    qkv = qkv.reshape(B, S, NUM_KV_HEADS, 2 + KV_GROUPS, HEAD_DIM)
    q = jnp.transpose(
        qkv[..., :KV_GROUPS, :].reshape(B, S, NUM_HEADS, HEAD_DIM), (0, 2, 1, 3))
    k = jnp.transpose(qkv[..., -2, :], (0, 2, 1, 3))
    v = jnp.transpose(qkv[..., -1, :], (0, 2, 1, 3))

    inv_freq = 1.0 / (ROPE_THETA ** (
        jnp.arange(0, HEAD_DIM, 2, dtype=jnp.float32) / HEAD_DIM))
    freqs = position_ids.astype(jnp.float32)[:, :, None] * inv_freq[None, None, :]
    emb = jnp.concatenate([freqs, freqs], axis=-1)
    cos = jnp.cos(emb)[:, None, :, :]
    sin = jnp.sin(emb)[:, None, :, :]

    def rot(x):
        h = x.shape[-1] // 2
        return jnp.concatenate([-x[..., h:], x[..., :h]], axis=-1)

    q = q * cos + rot(q) * sin
    k = k * cos + rot(k) * sin
    k = jnp.repeat(k, KV_GROUPS, axis=1)                    # repeat_kv
    v = jnp.repeat(v, KV_GROUPS, axis=1)

    scores = jnp.einsum('bhqd,bhkd->bhqk', q, k) / math.sqrt(HEAD_DIM)
    ii = jnp.arange(S)[:, None]
    jj = jnp.arange(S)[None, :]
    causal = jnp.where(jj <= ii, 0.0, NEG_INF).astype(jnp.float32)
    scores = scores + causal[None, None]
    p = jax.nn.softmax(scores.astype(jnp.float32), axis=-1)
    attn = jnp.einsum('bhqk,bhkd->bhqd', p, v)
    attn = jnp.transpose(attn, (0, 2, 1, 3)).reshape(B, S, NUM_HEADS * HEAD_DIM)
    return attn @ wo.T


# ----------------------------------- main --------------------------------------
if __name__ == "__main__":
    key = jax.random.PRNGKey(0)
    k1, k2, k3 = jax.random.split(key, 3)

    hidden_states = jax.random.normal(k1, (BATCH, SEQ, HIDDEN), dtype=jnp.float32)
    # nn.Linear weights (bias=False): wqkv (QKV_OUT, HIDDEN), wo (HIDDEN, H*D)
    wqkv = jax.random.normal(k2, (QKV_OUT, HIDDEN), dtype=jnp.float32) * 0.05
    wo = jax.random.normal(k3, (HIDDEN, NUM_HEADS * HEAD_DIM),
                           dtype=jnp.float32) * 0.05

    position_ids = jnp.broadcast_to(
        jnp.arange(SEQ, dtype=jnp.int32)[None, :], (BATCH, SEQ))

    ref = reference_forward(hidden_states, position_ids, wqkv, wo)

    # Exercise both grid strategies (flattened single step, and the 2-wide
    # "parallel" batch axis used on multi-TensorCore chips) so either code
    # path is validated regardless of which chip this runs on.
    for flat in (True, False):
        out = internlm2_attention_forward(hidden_states, position_ids, wqkv, wo,
                                          flatten_batch=flat)
        out = jax.block_until_ready(out)
        assert out.shape == (BATCH, SEQ, HIDDEN)
        max_err = float(jnp.max(jnp.abs(out - ref)))
        assert jnp.allclose(out, ref, atol=2e-3, rtol=2e-3), (flat, max_err)

    # Default (chip-aware) path once more, just to confirm it runs cleanly.
    out = jax.block_until_ready(
        internlm2_attention_forward(hidden_states, position_ids, wqkv, wo))
    assert jnp.allclose(out, ref, atol=2e-3, rtol=2e-3)

    print("KERNEL_OK")
</pallas_src>

<mosaic_0001>
module attributes {stable_mosaic.version = 11 : i64} {
  func.func @_fused_attn_kernel(%arg0: i32, %arg1: memref<16x32xf32, #tpu.memory_space<vmem>>, %arg2: memref<64x32xf32, #tpu.memory_space<vmem>>, %arg3: memref<32x32xf32, #tpu.memory_space<vmem>>, %arg4: memref<16x96xf32, #tpu.memory_space<vmem>>, %arg5: memref<32x32xf32, #tpu.memory_space<vmem>>, %arg6: memref<16x16xf32, #tpu.memory_space<vmem>>, %arg7: memref<16x16xf32, #tpu.memory_space<vmem>>, %arg8: memref<16x32xf32, #tpu.memory_space<vmem>>, %arg9: memref<16x32xf32, #tpu.memory_space<vmem>>) attributes {dimension_semantics = [#tpu.dimension_semantics<parallel>], iteration_bounds = array<i64: 1>, scalar_prefetch = 0 : i64, scratch_operands = 1 : i64, tpu.core_type = #tpu.core_type<tc>, window_params = [{transform_indices = @transform_0, window_bounds = array<i64: 16, 32>}, {pipeline_mode = #tpu.pipeline_mode<synchronous>, transform_indices = @transform_1, window_bounds = array<i64: 64, 32>}, {pipeline_mode = #tpu.pipeline_mode<synchronous>, transform_indices = @transform_2, window_bounds = array<i64: 32, 32>}, {transform_indices = @transform_3, window_bounds = array<i64: 16, 96>}, {pipeline_mode = #tpu.pipeline_mode<synchronous>, transform_indices = @transform_4, window_bounds = array<i64: 32, 32>}, {pipeline_mode = #tpu.pipeline_mode<synchronous>, transform_indices = @transform_5, window_bounds = array<i64: 16, 16>}, {pipeline_mode = #tpu.pipeline_mode<synchronous>, transform_indices = @transform_6, window_bounds = array<i64: 16, 16>}, {transform_indices = @transform_7, window_bounds = array<i64: 16, 32>}]} {
    %c0 = arith.constant 0 : index
    %c0_0 = arith.constant 0 : index
    %0 = vector.load %arg1[%c0, %c0_0] : memref<16x32xf32, #tpu.memory_space<vmem>>, vector<16x32xf32>
    %c0_1 = arith.constant 0 : index
    %c0_2 = arith.constant 0 : index
    %1 = vector.load %arg2[%c0_1, %c0_2] : memref<64x32xf32, #tpu.memory_space<vmem>>, vector<64x32xf32>
    %cst = arith.constant dense<0.000000e+00> : vector<16x64xf32>
    %2 = tpu.matmul %0, %1, %cst {dimension_numbers = #tpu.dot_dimension_numbers<[1], [1], [0], [0], [0, 0, 1, 0], [], []>} : vector<16x32xf32>, vector<64x32xf32>, vector<16x64xf32> -> vector<16x64xf32>
    %3 = vector.extract_strided_slice %2 {offsets = [0, 0], sizes = [16, 32], strides = [1, 1]} : vector<16x64xf32> to vector<16x32xf32>
    %4 = vector.extract_strided_slice %2 {offsets = [0, 32], sizes = [16, 16], strides = [1, 1]} : vector<16x64xf32> to vector<16x16xf32>
    %5 = vector.extract_strided_slice %2 {offsets = [0, 48], sizes = [16, 16], strides = [1, 1]} : vector<16x64xf32> to vector<16x16xf32>
    %c0_3 = arith.constant 0 : index
    %c0_4 = arith.constant 0 : index
    %6 = vector.load %arg4[%c0_3, %c0_4] : memref<16x96xf32, #tpu.memory_space<vmem>>, vector<16x96xf32>
    %7 = vector.extract_strided_slice %6 {offsets = [0, 0], sizes = [16, 32], strides = [1, 1]} : vector<16x96xf32> to vector<16x32xf32>
    %8 = vector.extract_strided_slice %6 {offsets = [0, 32], sizes = [16, 32], strides = [1, 1]} : vector<16x96xf32> to vector<16x32xf32>
    %9 = vector.extract_strided_slice %6 {offsets = [0, 64], sizes = [16, 16], strides = [1, 1]} : vector<16x96xf32> to vector<16x16xf32>
    %10 = vector.extract_strided_slice %6 {offsets = [0, 80], sizes = [16, 16], strides = [1, 1]} : vector<16x96xf32> to vector<16x16xf32>
    %11 = arith.mulf %3, %7 : vector<16x32xf32>
    %c0_5 = arith.constant 0 : index
    %c0_6 = arith.constant 0 : index
    %12 = vector.load %arg5[%c0_5, %c0_6] : memref<32x32xf32, #tpu.memory_space<vmem>>, vector<32x32xf32>
    %cst_7 = arith.constant dense<0.000000e+00> : vector<16x32xf32>
    %13 = tpu.matmul %3, %12, %cst_7 {dimension_numbers = #tpu.dot_dimension_numbers<[1], [0], [0], [1], [0, 0, 1, 1], [], []>} : vector<16x32xf32>, vector<32x32xf32>, vector<16x32xf32> -> vector<16x32xf32>
    %14 = arith.mulf %13, %8 : vector<16x32xf32>
    %15 = arith.addf %11, %14 : vector<16x32xf32>
    %16 = arith.mulf %4, %9 : vector<16x16xf32>
    %c0_8 = arith.constant 0 : index
    %c0_9 = arith.constant 0 : index
    %17 = vector.load %arg6[%c0_8, %c0_9] : memref<16x16xf32, #tpu.memory_space<vmem>>, vector<16x16xf32>
    %cst_10 = arith.constant dense<0.000000e+00> : vector<16x16xf32>
    %18 = tpu.matmul %4, %17, %cst_10 {dimension_numbers = #tpu.dot_dimension_numbers<[1], [0], [0], [1], [0, 0, 1, 1], [], []>} : vector<16x16xf32>, vector<16x16xf32>, vector<16x16xf32> -> vector<16x16xf32>
    %19 = arith.mulf %18, %10 : vector<16x16xf32>
    %20 = arith.addf %16, %19 : vector<16x16xf32>
    %c0_11 = arith.constant 0 : index
    %c0_12 = arith.constant 0 : index
    %21 = vector.load %arg7[%c0_11, %c0_12] : memref<16x16xf32, #tpu.memory_space<vmem>>, vector<16x16xf32>
    %22 = vector.extract_strided_slice %15 {offsets = [0, 0], sizes = [16, 8], strides = [1, 1]} : vector<16x32xf32> to vector<16x8xf32>
    %23 = vector.extract_strided_slice %20 {offsets = [0, 0], sizes = [16, 8], strides = [1, 1]} : vector<16x16xf32> to vector<16x8xf32>
    %24 = vector.extract_strided_slice %5 {offsets = [0, 0], sizes = [16, 8], strides = [1, 1]} : vector<16x16xf32> to vector<16x8xf32>
    %cst_13 = arith.constant dense<0.000000e+00> : vector<16x16xf32>
    %25 = tpu.matmul %22, %23, %cst_13 {dimension_numbers = #tpu.dot_dimension_numbers<[1], [1], [0], [0], [0, 0, 1, 0], [], []>} : vector<16x8xf32>, vector<16x8xf32>, vector<16x16xf32> -> vector<16x16xf32>
    %26 = arith.addf %25, %21 : vector<16x16xf32>
    %cst_14 = arith.constant dense<0xFF800000> : vector<16xf32>
    %27 = vector.multi_reduction <maximumf>, %26, %cst_14 [1] : vector<16x16xf32> to vector<16xf32>
    %28 = vector.shape_cast %27 : vector<16xf32> to vector<16x1xf32>
    %29 = vector.broadcast %28 : vector<16x1xf32> to vector<16x16xf32>
    %30 = arith.subf %26, %29 : vector<16x16xf32>
    %31 = math.exp %30 : vector<16x16xf32>
    %cst_15 = arith.constant dense<0.000000e+00> : vector<16xf32>
    %32 = vector.multi_reduction <add>, %31, %cst_15 [1] : vector<16x16xf32> to vector<16xf32>
    %33 = vector.shape_cast %32 : vector<16xf32> to vector<16x1xf32>
    %34 = vector.broadcast %33 : vector<16x1xf32> to vector<16x16xf32>
    %35 = arith.divf %31, %34 : vector<16x16xf32>
    %cst_16 = arith.constant dense<0.000000e+00> : vector<16x8xf32>
    %36 = tpu.matmul %35, %24, %cst_16 {dimension_numbers = #tpu.dot_dimension_numbers<[1], [0], [0], [1], [0, 0, 1, 1], [], []>} : vector<16x16xf32>, vector<16x8xf32>, vector<16x8xf32> -> vector<16x8xf32>
    %c0_17 = arith.constant 0 : index
    %c0_18 = arith.constant 0 : index
    %37 = vector.load %arg9[%c0_17, %c0_18] : memref<16x32xf32, #tpu.memory_space<vmem>>, vector<16x8xf32>
    tpu.vector_store %arg9[%c0_17, %c0_18], %36 {strides = array<i32>} : memref<16x32xf32, #tpu.memory_space<vmem>>, vector<16x8xf32>,
    %38 = vector.extract_strided_slice %15 {offsets = [0, 8], sizes = [16, 8], strides = [1, 1]} : vector<16x32xf32> to vector<16x8xf32>
    %39 = vector.extract_strided_slice %20 {offsets = [0, 0], sizes = [16, 8], strides = [1, 1]} : vector<16x16xf32> to vector<16x8xf32>
    %40 = vector.extract_strided_slice %5 {offsets = [0, 0], sizes = [16, 8], strides = [1, 1]} : vector<16x16xf32> to vector<16x8xf32>
    %cst_19 = arith.constant dense<0.000000e+00> : vector<16x16xf32>
    %41 = tpu.matmul %38, %39, %cst_19 {dimension_numbers = #tpu.dot_dimension_numbers<[1], [1], [0], [0], [0, 0, 1, 0], [], []>} : vector<16x8xf32>, vector<16x8xf32>, vector<16x16xf32> -> vector<16x16xf32>
    %42 = arith.addf %41, %21 : vector<16x16xf32>
    %cst_20 = arith.constant dense<0xFF800000> : vector<16xf32>
    %43 = vector.multi_reduction <maximumf>, %42, %cst_20 [1] : vector<16x16xf32> to vector<16xf32>
    %44 = vector.shape_cast %43 : vector<16xf32> to vector<16x1xf32>
    %45 = vector.broadcast %44 : vector<16x1xf32> to vector<16x16xf32>
    %46 = arith.subf %42, %45 : vector<16x16xf32>
    %47 = math.exp %46 : vector<16x16xf32>
    %cst_21 = arith.constant dense<0.000000e+00> : vector<16xf32>
    %48 = vector.multi_reduction <add>, %47, %cst_21 [1] : vector<16x16xf32> to vector<16xf32>
    %49 = vector.shape_cast %48 : vector<16xf32> to vector<16x1xf32>
    %50 = vector.broadcast %49 : vector<16x1xf32> to vector<16x16xf32>
    %51 = arith.divf %47, %50 : vector<16x16xf32>
    %cst_22 = arith.constant dense<0.000000e+00> : vector<16x8xf32>
    %52 = tpu.matmul %51, %40, %cst_22 {dimension_numbers = #tpu.dot_dimension_numbers<[1], [0], [0], [1], [0, 0, 1, 1], [], []>} : vector<16x16xf32>, vector<16x8xf32>, vector<16x8xf32> -> vector<16x8xf32>
    %c0_23 = arith.constant 0 : index
    %c8 = arith.constant 8 : index
    %53 = vector.load %arg9[%c0_23, %c8] : memref<16x32xf32, #tpu.memory_space<vmem>>, vector<16x8xf32>
    tpu.vector_store %arg9[%c0_23, %c8], %52 {strides = array<i32>} : memref<16x32xf32, #tpu.memory_space<vmem>>, vector<16x8xf32>,
    %54 = vector.extract_strided_slice %15 {offsets = [0, 16], sizes = [16, 8], strides = [1, 1]} : vector<16x32xf32> to vector<16x8xf32>
    %55 = vector.extract_strided_slice %20 {offsets = [0, 8], sizes = [16, 8], strides = [1, 1]} : vector<16x16xf32> to vector<16x8xf32>
    %56 = vector.extract_strided_slice %5 {offsets = [0, 8], sizes = [16, 8], strides = [1, 1]} : vector<16x16xf32> to vector<16x8xf32>
    %cst_24 = arith.constant dense<0.000000e+00> : vector<16x16xf32>
    %57 = tpu.matmul %54, %55, %cst_24 {dimension_numbers = #tpu.dot_dimension_numbers<[1], [1], [0], [0], [0, 0, 1, 0], [], []>} : vector<16x8xf32>, vector<16x8xf32>, vector<16x16xf32> -> vector<16x16xf32>
    %58 = arith.addf %57, %21 : vector<16x16xf32>
    %cst_25 = arith.constant dense<0xFF800000> : vector<16xf32>
    %59 = vector.multi_reduction <maximumf>, %58, %cst_25 [1] : vector<16x16xf32> to vector<16xf32>
    %60 = vector.shape_cast %59 : vector<16xf32> to vector<16x1xf32>
    %61 = vector.broadcast %60 : vector<16x1xf32> to vector<16x16xf32>
    %62 = arith.subf %58, %61 : vector<16x16xf32>
    %63 = math.exp %62 : vector<16x16xf32>
    %cst_26 = arith.constant dense<0.000000e+00> : vector<16xf32>
    %64 = vector.multi_reduction <add>, %63, %cst_26 [1] : vector<16x16xf32> to vector<16xf32>
    %65 = vector.shape_cast %64 : vector<16xf32> to vector<16x1xf32>
    %66 = vector.broadcast %65 : vector<16x1xf32> to vector<16x16xf32>
    %67 = arith.divf %63, %66 : vector<16x16xf32>
    %cst_27 = arith.constant dense<0.000000e+00> : vector<16x8xf32>
    %68 = tpu.matmul %67, %56, %cst_27 {dimension_numbers = #tpu.dot_dimension_numbers<[1], [0], [0], [1], [0, 0, 1, 1], [], []>} : vector<16x16xf32>, vector<16x8xf32>, vector<16x8xf32> -> vector<16x8xf32>
    %c0_28 = arith.constant 0 : index
    %c16 = arith.constant 16 : index
    %69 = vector.load %arg9[%c0_28, %c16] : memref<16x32xf32, #tpu.memory_space<vmem>>, vector<16x8xf32>
    tpu.vector_store %arg9[%c0_28, %c16], %68 {strides = array<i32>} : memref<16x32xf32, #tpu.memory_space<vmem>>, vector<16x8xf32>,
    %70 = vector.extract_strided_slice %15 {offsets = [0, 24], sizes = [16, 8], strides = [1, 1]} : vector<16x32xf32> to vector<16x8xf32>
    %71 = vector.extract_strided_slice %20 {offsets = [0, 8], sizes = [16, 8], strides = [1, 1]} : vector<16x16xf32> to vector<16x8xf32>
    %72 = vector.extract_strided_slice %5 {offsets = [0, 8], sizes = [16, 8], strides = [1, 1]} : vector<16x16xf32> to vector<16x8xf32>
    %cst_29 = arith.constant dense<0.000000e+00> : vector<16x16xf32>
    %73 = tpu.matmul %70, %71, %cst_29 {dimension_numbers = #tpu.dot_dimension_numbers<[1], [1], [0], [0], [0, 0, 1, 0], [], []>} : vector<16x8xf32>, vector<16x8xf32>, vector<16x16xf32> -> vector<16x16xf32>
    %74 = arith.addf %73, %21 : vector<16x16xf32>
    %cst_30 = arith.constant dense<0xFF800000> : vector<16xf32>
    %75 = vector.multi_reduction <maximumf>, %74, %cst_30 [1] : vector<16x16xf32> to vector<16xf32>
    %76 = vector.shape_cast %75 : vector<16xf32> to vector<16x1xf32>
    %77 = vector.broadcast %76 : vector<16x1xf32> to vector<16x16xf32>
    %78 = arith.subf %74, %77 : vector<16x16xf32>
    %79 = math.exp %78 : vector<16x16xf32>
    %cst_31 = arith.constant dense<0.000000e+00> : vector<16xf32>
    %80 = vector.multi_reduction <add>, %79, %cst_31 [1] : vector<16x16xf32> to vector<16xf32>
    %81 = vector.shape_cast %80 : vector<16xf32> to vector<16x1xf32>
    %82 = vector.broadcast %81 : vector<16x1xf32> to vector<16x16xf32>
    %83 = arith.divf %79, %82 : vector<16x16xf32>
    %cst_32 = arith.constant dense<0.000000e+00> : vector<16x8xf32>
    %84 = tpu.matmul %83, %72, %cst_32 {dimension_numbers = #tpu.dot_dimension_numbers<[1], [0], [0], [1], [0, 0, 1, 1], [], []>} : vector<16x16xf32>, vector<16x8xf32>, vector<16x8xf32> -> vector<16x8xf32>
    %c0_33 = arith.constant 0 : index
    %c24 = arith.constant 24 : index
    %85 = vector.load %arg9[%c0_33, %c24] : memref<16x32xf32, #tpu.memory_space<vmem>>, vector<16x8xf32>
    tpu.vector_store %arg9[%c0_33, %c24], %84 {strides = array<i32>} : memref<16x32xf32, #tpu.memory_space<vmem>>, vector<16x8xf32>,
    %c0_34 = arith.constant 0 : index
    %c0_35 = arith.constant 0 : index
    %86 = vector.load %arg9[%c0_34, %c0_35] : memref<16x32xf32, #tpu.memory_space<vmem>>, vector<16x32xf32>
    %c0_36 = arith.constant 0 : index
    %c0_37 = arith.constant 0 : index
    %87 = vector.load %arg3[%c0_36, %c0_37] : memref<32x32xf32, #tpu.memory_space<vmem>>, vector<32x32xf32>
    %cst_38 = arith.constant dense<0.000000e+00> : vector<16x32xf32>
    %88 = tpu.matmul %86, %87, %cst_38 {dimension_numbers = #tpu.dot_dimension_numbers<[1], [1], [0], [0], [0, 0, 1, 0], [], []>} : vector<16x32xf32>, vector<32x32xf32>, vector<16x32xf32> -> vector<16x32xf32>
    %c0_39 = arith.constant 0 : index
    %c0_40 = arith.constant 0 : index
    %89 = vector.load %arg8[%c0_39, %c0_40] : memref<16x32xf32, #tpu.memory_space<vmem>>, vector<16x32xf32>
    tpu.vector_store %arg8[%c0_39, %c0_40], %88 {strides = array<i32>} : memref<16x32xf32, #tpu.memory_space<vmem>>, vector<16x32xf32>,
    return
  }
  func.func @transform_0(%arg0: i32) -> (i32, i32) {
    %c0_i32 = arith.constant 0 : i32
    %c0_i32_0 = arith.constant 0 : i32
    return %arg0, %c0_i32 : i32, i32
  }
  func.func @transform_1(%arg0: i32) -> (i32, i32) {
    %c0_i32 = arith.constant 0 : i32
    %c0_i32_0 = arith.constant 0 : i32
    %c0_i32_1 = arith.constant 0 : i32
    return %c0_i32, %c0_i32_0 : i32, i32
  }
  func.func @transform_2(%arg0: i32) -> (i32, i32) {
    %c0_i32 = arith.constant 0 : i32
    %c0_i32_0 = arith.constant 0 : i32
    %c0_i32_1 = arith.constant 0 : i32
    return %c0_i32, %c0_i32_0 : i32, i32
  }
  func.func @transform_3(%arg0: i32) -> (i32, i32) {
    %c0_i32 = arith.constant 0 : i32
    %c0_i32_0 = arith.constant 0 : i32
    return %arg0, %c0_i32 : i32, i32
  }
  func.func @transform_4(%arg0: i32) -> (i32, i32) {
    %c0_i32 = arith.constant 0 : i32
    %c0_i32_0 = arith.constant 0 : i32
    %c0_i32_1 = arith.constant 0 : i32
    return %c0_i32, %c0_i32_0 : i32, i32
  }
  func.func @transform_5(%arg0: i32) -> (i32, i32) {
    %c0_i32 = arith.constant 0 : i32
    %c0_i32_0 = arith.constant 0 : i32
    %c0_i32_1 = arith.constant 0 : i32
    return %c0_i32, %c0_i32_0 : i32, i32
  }
  func.func @transform_6(%arg0: i32) -> (i32, i32) {
    %c0_i32 = arith.constant 0 : i32
    %c0_i32_0 = arith.constant 0 : i32
    %c0_i32_1 = arith.constant 0 : i32
    return %c0_i32, %c0_i32_0 : i32, i32
  }
  func.func @transform_7(%arg0: i32) -> (i32, i32) {
    %c0_i32 = arith.constant 0 : i32
    %c0_i32_0 = arith.constant 0 : i32
    return %arg0, %c0_i32 : i32, i32
  }
}

</mosaic_0001>

<bundles_post_ra>
// kernel: tpu_custom_call.1
= control target key start
LH: loop header
LB: loop body
LE: loop exit
PB: predicated region body
PF: predicated region fallthrough
CT: control target
= control target key end

     0   :  { %12 = vsyncpa [#allocation4], 0  ;;  %s1999_s0 = inlined_call_operand.vmem [shape: f32[16,32], index: 0, kind: input, shape index: {}]   ;;  %s2000_s1 = inlined_call_operand.vmem [shape: f32[64,32], index: 1, kind: input, shape index: {}]   ;;  %s2001_s2 = inlined_call_operand.vmem [shape: f32[32,32], index: 2, kind: input, shape index: {}]   ;;  %s2002_s3 = inlined_call_operand.vmem [shape: f32[16,96], index: 3, kind: input, shape index: {}]   ;;  %s2003_s4 = inlined_call_operand.vmem [shape: f32[32,32], index: 4, kind: input, shape index: {}]   ;;  %s2004_s5 = inlined_call_operand.vmem [shape: f32[16,16], index: 5, kind: input, shape index: {}]   ;;  %s2005_s6 = inlined_call_operand.hbm [shape: f32[16,16], index: 6, kind: input, shape index: {}]   ;;  %s2006_s7 = inlined_call_operand.hbm [shape: f32[16,32], index: 7, kind: output, shape index: {}]  }
   0x1   :  { %13 = vsyncpa [#allocation5], 0  ;;  %s1701_s24 = smov [#allocation3]   ;;  %s1653_s28 = scalar_lea.hbm %s2005_s6, 256 }
   0x2   :  { %s31_s25 = sshll.u32 %s1701_s24, 4  ;;  %p1654_p0 = scmp.ne.s32.totalorder %s2005_s6, %s1653_s28  ;;  %s32_s25 = int_to_ptr.vmem [resolvable:$true] %s31_s25 }
   0x3   :  { %p1657_p1 = scmp.lt.u32.totalorder %s1653_s28, %s2005_s6 }
   0x5   :  { %p1659_p2 = pnand %p1657_p1, %p1654_p0 }
   0x7   :  { %1662 = shalt.err (!%p1659_p2)
}
   0x8   :  { %s1663_s10 = scalar_lea.vmem %s32_s25, 256  ;;  %p1668_p4 = scmp.lt.s32.totalorder %s32_s25, %s32_s25 }
   0x9   :  { %p1664_p3 = scmp.ne.s32.totalorder %s32_s25, %s1663_s10  ;;  %p1669_p5 = scmp.lt.s32.totalorder %s1663_s10, %s1663_s10 }
   0xb   :  { %p1670_p6 = por %p1669_p5, %p1668_p4 }
   0xd   :  { %p1671_p7 = pnand %p1670_p6, %p1664_p3 }
   0xf   :  { %1674 = shalt.err (!%p1671_p7)
}
  0x10   :  { %s1702_s11 = smov 128   ;;  %s1703_s12 = smov 8  }
  0x11   :  { %37 = dma.hbm_to_vmem [thread:$0]  %s2005_s6, 256, %s32_s25, [#allocation4], %s1702_s11, %s1702_s11, %s1703_s12  }
  0x12   :  { %1697 = dma.done.wait [#allocation4], 256  }
  0x13   :  { %1698 = vsyncadd [#allocation4], 4294967040  ;;  %vm51_vm0 = vcmask 261120   ;;  %v43_v1 = vld [vmem:[%s2000_s1] sm:$0xff]  ;;  %v44_v2 = vld [vmem:[%s2000_s1 + $0x8] sm:$0xff]  ;;  %s1704_s26 = smov 48  }
  0x14   :  { %vm1773_vm1 = vmpackc.low %vm51_vm0, %vm51_vm0  ;;  %v45_v3 = vld [vmem:[%s2000_s1 + $0x10] sm:$0xff]  ;;  %v1498_v4 = vpack.c.bf16 %v44_v2, %v43_v1  ;;  %v46_v5 = vld [vmem:[%s2000_s1 + $0x18] sm:$0xff]  ;;  %s1705_s10 = smov 96   ;;  %vm266_vm2 = vcmask 130048   ;;  %vm372_vm3 = vcmask 64512   ;;  %s1709_s28 = smov 80  }
  0x15   :  { %v1504_v6 = vpack.c.bf16 %v46_v5, %v45_v3  ;;  %v41_v7 = vld [vmem:[%s1999_s0] sm:$0xff]  ;;  %v158_v9 = vld [vmem:[%s2002_s3 + $0x8] sm:$0xff]  ;;  %v49_v13 = vld [vmem:[%s2000_s1 + $0x30] sm:$0xff]  ;;  %s1710_s29 = smov 112   ;;  %s1711_s30 = smov 104   ;;  %vm763_vm5 = vcmask 130112  }
  0x16   :  { %1500 = vmatprep.subr.msk.bf16.mxu0 %vm1773_vm1, %v1498_v4  ;;  %1410 = vmatprep.mubr.msk.f32.mxu0 %vm51_vm0, %v41_v7  ;;  %v157_v8 = vld [vmem:[%s2002_s3] sm:$0xff]  ;;  %v48_v11 = vld [vmem:[%s2000_s1 + $0x28] sm:$0xff]  ;;  %v50_v14 = vld [vmem:[%s2000_s1 + $0x38] sm:$0xff]  ;;  %s1712_s8 = smov 72   ;;  %s1713_s9 = smov 16   ;;  %vm974_vm6 = vcmask 195712  }
  0x17   :  { %1503 = vmatpush3.bf16.xpose.msk.msra.mxu0 %vm1773_vm1, %v1498_v4  ;;  %346 = vrot.lane.b32.xlu1 %v157_v8, %s1704_s26  ;;  %v47_v10 = vld [vmem:[%s2000_s1 + $0x20] sm:$0xff]  ;;  %v1516_v15 = vpack.c.bf16 %v50_v14, %v49_v13  ;;  %v162_v17 = vld [vmem:[%s2003_s4 + $0x8] sm:$0xff]  ;;  %v163_v19 = vld [vmem:[%s2003_s4 + $0x10] sm:$0xff]  ;;  %s1714_s19 = smov 24   ;;  %vm1171_vm7 = vcmask 261312  }
  0x18   :  { %1506 = vmatprep.subr.msk.bf16.mxu0 %vm1773_vm1, %v1504_v6  ;;  %v1510_v12 = vpack.c.bf16 %v48_v11, %v47_v10  ;;  %v161_v16 = vld [vmem:[%s2003_s4] sm:$0xff]  ;;  %v164_v20 = vld [vmem:[%s2003_s4 + $0x18] sm:$0xff]  ;;  %v42_v21 = vld [vmem:[%s1999_s0 + $0x8] sm:$0xff]  ;;  %s1706_s0 = smov 32   ;;  %s1707_s4 = smov 120  }
  0x19   :  { %v1522_v18 = vpack.c.bf16 %v162_v17, %v161_v16  ;;  %v1526_v22 = vpack.c.bf16 %v164_v20, %v163_v19  ;;  %v260_v23 = vld [vmem:[%s2004_s5] sm:$0xff]  ;;  %v261_v24 = vld [vmem:[%s2004_s5 + $0x8] sm:$0xff]  ;;  %vm1868_vm4 = vmpackc.low %vm372_vm3, %vm372_vm3  ;;  %s1708_s5 = smov 88  }
  0x1a   :  { %v1530_v25 = vpack.c.bf16 %v261_v24, %v260_v23  ;;  %v1882_v59 = vld [vmem:[#allocation3 + $0x8] sm:$0xff]  ;;  %v1884_v60 = vld [vmem:[#allocation3] sm:$0xff] }
  0x1b   :  { %348 = vrot.lane.b32.xlu1 %v158_v9, %s1704_s26 }
  0x1c   :  { %1531 = vmatprep.subr.bf16.mxu1 %v1530_v25 }
  0x1d   :  { %1533 = vmatpush3.bf16.msra.mxu1 %v1530_v25 }
  0x1f   :  { %1509 = vmatpush3.bf16.xpose.msk.msra.mxu0 %vm1773_vm1, %v1504_v6  ;;  %250 = vrot.lane.b32.xlu1 %v158_v9, %s1705_s10 }
  0x20   :  { %1512 = vmatprep.subr.msk.bf16.mxu0 %vm1773_vm1, %v1510_v12 }
  0x27   :  { %1515 = vmatpush3.bf16.xpose.msk.msra.mxu0 %vm1773_vm1, %v1510_v12 }
  0x28   :  { %1518 = vmatprep.subr.msk.bf16.mxu0 %vm1773_vm1, %v1516_v15 }
  0x2f   :  { %1521 = vmatpush3.bf16.xpose.msk.msra.mxu0 %vm1773_vm1, %v1516_v15 }
  0x30   :  { %1523 = vmatprep.subr.bf16.mxu0 %v1522_v18 }
  0x36   :  { %1411 = vmatmul.mubr.msk.f32.vlgmr.msra.gmra.mrb[0].mxu0 %vm51_vm0, %v42_v21 }
  0x37   :  { %1525 = vmatpush3.bf16.msra.mxu0 %v1522_v18 }
  0x38   :  { %1527 = vmatprep.subr.bf16.mxu0 %v1526_v22 }
  0x3b   :  { %1529 = vmatpush3.bf16.msra.mxu0 %v1526_v22 }
  0x89   :  { %v347_v31 = vpop.permute.xlu1 %346 }
  0x8d   :  { %v349_v32 = vpop.permute.xlu1 %348 }
  0x91   :  { %v251_v33 = vpop.permute.xlu1 %250 }
 0x109   :  { %v1412_v26 = vpop.f32.mrb[0].mxu0 }
 0x10a   :  { %v148_v27 = vpop.f32.mrb[1].mxu0  ;;  %v160_v36 = vmul.f32 %v1412_v26, %v158_v9  ;;  %v259_v47 = vmul.f32 %v1412_v26, %v251_v33 }
 0x10b   :  { %262 = vrot.lane.b32.xlu0 %v148_v27, %s1705_s10  ;;  %1421 = vmatprep.mubr.msk.f32.mxu0 %vm51_vm0, %v148_v27  ;;  %v1852_v28 = vpack.i.bf16 %v1412_v26, %v148_v27  ;;  %v159_v39 = vmul.f32 %v157_v8, %v148_v27 }
 0x10c   :  { %1422 = vmatmul.mubr.msk.f32.vlgmr.msra.gmra.mrb[2].mxu0 %vm51_vm0, %v1412_v26 }
 0x10f   :  { %264 = vrot.lane.b32.xlu0 %v1412_v26, %s1705_s10 }
 0x113   :  { %248 = vrot.lane.b32.xlu0 %v157_v8, %s1705_s10 }
 0x17d   :  { %v263_v29 = vpop.permute.xlu0 %262 }
 0x17e   :  { %1428 = vmatprep.mubr.msk.f32.mxu1 %vm266_vm2, %v263_v29 }
 0x181   :  { %v265_v30 = vpop.permute.xlu0 %264 }
 0x182   :  { %1429 = vmatmul.mubr.msk.f32.vlgmr.msra.gmra.mrb[0].mxu1 %vm266_vm2, %v265_v30 }
 0x185   :  { %v249_v35 = vpop.permute.xlu0 %248 }
 0x186   :  { %v258_v48 = vmul.f32 %v249_v35, %v148_v27 }
 0x1df   :  { %v1423_v34 = vpop.f32.mrb[2].mxu0 }
 0x1e0   :  { %v255_v37 = vmul.f32 %v1423_v34, %v251_v33  ;;  %v237_v38 = vpop.f32.mrb[3].mxu0 }
 0x1e1   :  { %v254_v40 = vmul.f32 %v249_v35, %v237_v38 }
 0x1e2   :  { %v1859_v41 = vadd.f32 %v255_v37, %v160_v36 }
 0x1e3   :  { %v1861_v42 = vadd.f32 %v254_v40, %v159_v39 }
 0x1e5   :  { %1435 = vmatprep.mubr.msk.f32.mxu1 %vm372_vm3, %v1861_v42 }
 0x255   :  { %v1430_v43 = vpop.f32.mrb[0].mxu1 }
 0x256   :  { %v353_v44 = vmul.f32 %v1430_v43, %v349_v32  ;;  %v337_v45 = vpop.f32.mrb[1].mxu1 }
 0x257   :  { %v352_v46 = vmul.f32 %v347_v31, %v337_v45 }
 0x258   :  { %358 = vrot.lane.b32.xlu1 %v353_v44, %s1706_s0 }
 0x259   :  { %356 = vrot.lane.b32.xlu0 %v352_v46, %s1706_s0 }
 0x2ca   :  { %v359_v49 = vpop.permute.xlu1 %358 }
 0x2cb   :  { %v363_v50 = vadd.f32 %v359_v49, %v259_v47  ;;  %v357_v51 = vpop.permute.xlu0 %356 }
 0x2cc   :  { %v362_v52 = vadd.f32 %v357_v51, %v258_v48 }
 0x2ce   :  { %v1611_v53 = vpack.i.bf16 %v363_v50, %v362_v52 }
 0x2d0   :  { %1602 = vrot.lane.b32.xlu0 %v1611_v53, %s1705_s10 }
 0x342   :  { %v1603_v54 = vpop.permute.xlu0 %1602 }
 0x343   :  { %v1605_v55 = vunpack.i.h.bf16 %v1603_v54  ;;  %v1604_v56 = vunpack.i.l.bf16 %v1603_v54 }
 0x345   :  { %v1872_v58 = vpack.c.bf16 %v1605_v55, %v1604_v56 }
 0x347   :  { %1536 = vmatprep.subr.msk.bf16.mxu1 %vm1868_vm4, %v1872_v58 }
 0x348   :  { %1539 = vmatpush3.bf16.xpose.msk.msra.mxu1 %vm1868_vm4, %v1872_v58 }
 0x34f   :  { %1436 = vmatmul.mubr.msk.f32.vlgmr.msra.gmra.mrb[2].mxu1 %vm372_vm3, %v1859_v41 }
 0x422   :  { %v1437_v61 = vpop.f32.mrb[2].mxu1 }
 0x423   :  { %v455_v62 = vadd.f32 %v1437_v61, %v1882_v59  ;;  %v449_v63 = vpop.f32.mrb[3].mxu1 }
 0x424   :  { %v450_v1 = vadd.f32 %v449_v63, %v1884_v60 }
 0x425   :  { %v461_v2 = vsel %vm266_vm2, %v455_v62, -inf }
 0x426   :  { %462 = vmax.xlane.f32.xlu0 %v461_v2  ;;  %v458_v3 = vsel %vm266_vm2, %v450_v1, -inf }
 0x427   :  { %459 = vmax.xlane.f32.xlu1 %v458_v3 }
 0x4b3   :  { %v463_v4 = vpop.xlane.xlu0 %462 }
 0x4b4   :  { %v465_v5 = vsub.f32 %v455_v62, %v463_v4  ;;  %v460_v6 = vpop.xlane.xlu1 %459 }
 0x4b5   :  { %v464_v7 = vsub.f32 %v450_v1, %v460_v6 }
 0x4b6   :  { %v468_v8 = vmul.f32 1.442695, %v465_v5 }
 0x4b7   :  { %v466_v9 = vmul.f32 1.442695, %v464_v7 }
 0x4b8   :  { %1621 = vpow2.f32 %v468_v8 }
 0x4b9   :  { %1623 = vpow2.f32 %v466_v9 }
 0x4c2   :  { %v1622_v10 = vpop.eup %1621 }
 0x4c3   :  { %v1624_v11 = vpop.eup %1623  ;;  %v473_v12 = vsel %vm266_vm2, %v1622_v10, 0.0 }
 0x4c4   :  { %474 = vadd.xlane.f32.xlu1 %v473_v12  ;;  %v470_v13 = vsel %vm266_vm2, %v1624_v11, 0.0 }
 0x4c5   :  { %471 = vadd.xlane.f32.xlu0 %v470_v13 }
 0x4d5   :  { %569 = vrot.lane.b32.xlu1 %v1861_v42, %s1707_s4 }
 0x4d9   :  { %1612 = vrot.lane.b32.xlu1 %v1611_v53, %s1708_s5 }
 0x4db   :  { %1607 = vrot.lane.b32.xlu0 %v1852_v28, %s1709_s28 }
 0x4dd   :  { %766 = vrot.lane.b32.xlu1 %v1861_v42, %s1710_s29 }
 0x4df   :  { %571 = vrot.lane.b32.xlu0 %v1859_v41, %s1707_s4 }
 0x4e3   :  { %768 = vrot.lane.b32.xlu0 %v1859_v41, %s1710_s29 }
 0x551   :  { %v475_v14 = vpop.xlane.xlu1 %474 }
 0x552   :  { %1625 = vrcp.f32 %v475_v14  ;;  %v472_v15 = vpop.xlane.xlu0 %471 }
 0x553   :  { %1627 = vrcp.f32 %v472_v15 }
 0x555   :  { %v570_v17 = vpop.permute.xlu1 %569 }
 0x556   :  { %v1608_v16 = vpop.permute.xlu0 %1607 }
 0x557   :  { %v1610_v18 = vunpack.i.h.bf16 %v1608_v16  ;;  %v1609_v19 = vunpack.i.l.bf16 %v1608_v16 }
 0x559   :  { %v1540_v20 = vpack.c.bf16 %v1610_v18, %v1609_v19  ;;  %v1613_v23 = vpop.permute.xlu1 %1612 }
 0x55a   :  { %v1615_v26 = vunpack.i.h.bf16 %v1613_v23  ;;  %v1614_v27 = vunpack.i.l.bf16 %v1613_v23  ;;  %v572_v30 = vpop.permute.xlu0 %571 }
 0x55b   :  { %1541 = vmatprep.subr.bf16.mxu1 %v1540_v20  ;;  %1551 = vmatprep.subr.bf16.mxu0 %v1540_v20 }
 0x55c   :  { %v1626_v21 = vpop.eup %1625  ;;  %1543 = vmatpush3.bf16.msra.mxu1 %v1540_v20  ;;  %1553 = vmatpush3.bf16.msra.mxu0 %v1540_v20  ;;  %v1903_v29 = vpack.c.bf16 %v1615_v26, %v1614_v27 }
 0x55d   :  { %v1628_v22 = vpop.eup %1627  ;;  %1546 = vmatprep.subr.msk.bf16.mxu1 %vm1868_vm4, %v1872_v58  ;;  %v479_v25 = vmul.f32 %v1626_v21, %v1622_v10  ;;  %v767_v31 = vpop.permute.xlu1 %766 }
 0x55e   :  { %v477_v24 = vmul.f32 %v1628_v22, %v1624_v11  ;;  %v769_v32 = vpop.permute.xlu0 %768 }
 0x560   :  { %1442 = vmatprep.mubr.msk.f32.mxu1 %vm266_vm2, %v477_v24 }
 0x561   :  { %1443 = vmatmul.mubr.msk.f32.vlgmr.msra.gmra.mrb[4].mxu1 %vm266_vm2, %v479_v25 }
 0x562   :  { %1449 = vmatprep.mubr.msk.f32.mxu1 %vm372_vm3, %v570_v17 }
 0x565   :  { %1549 = vmatpush3.bf16.xpose.msk.msra.mxu1 %vm1868_vm4, %v1872_v58 }
 0x566   :  { %1556 = vmatprep.subr.msk.bf16.mxu1 %vm1868_vm4, %v1903_v29 }
 0x56c   :  { %1450 = vmatmul.mubr.msk.f32.vlgmr.msra.gmra.mrb[6].mxu1 %vm372_vm3, %v572_v30 }
 0x56d   :  { %1559 = vmatpush3.bf16.xpose.msk.msra.mxu1 %vm1868_vm4, %v1903_v29  ;;  %1463 = vmatprep.mubr.msk.f32.mxu1 %vm372_vm3, %v767_v31 }
 0x574   :  { %1464 = vmatmul.mubr.msk.f32.vlgmr.msra.gmra.mrb[8].mxu1 %vm372_vm3, %v769_v32 }
 0x634   :  { %v1444_v33 = vpop.f32.mrb[4].mxu1 }
 0x635   :  { %568 = vst.msk [vmem:[#allocation2 + $0x8] sm:$0xff] %vm372_vm3, %v1444_v33  ;;  %v558_v34 = vpop.f32.mrb[5].mxu1 }
 0x636   :  { %567 = vst.msk [vmem:[#allocation2] sm:$0xff] %vm372_vm3, %v558_v34 }
 0x63f   :  { %v1451_v35 = vpop.f32.mrb[6].mxu1 }
 0x640   :  { %v649_v36 = vadd.f32 %v1451_v35, %v1882_v59  ;;  %v643_v37 = vpop.f32.mrb[7].mxu1 }
 0x641   :  { %v644_v38 = vadd.f32 %v643_v37, %v1884_v60 }
 0x642   :  { %v655_v39 = vsel %vm266_vm2, %v649_v36, -inf }
 0x643   :  { %656 = vmax.xlane.f32.xlu0 %v655_v39  ;;  %v652_v40 = vsel %vm266_vm2, %v644_v38, -inf }
 0x644   :  { %653 = vmax.xlane.f32.xlu1 %v652_v40 }
 0x647   :  { %v1465_v43 = vpop.f32.mrb[8].mxu1 }
 0x648   :  { %v854_v44 = vadd.f32 %v1465_v43, %v1882_v59  ;;  %v848_v45 = vpop.f32.mrb[9].mxu1 }
 0x649   :  { %v849_v46 = vadd.f32 %v848_v45, %v1884_v60 }
 0x64a   :  { %v860_v47 = vsel %vm266_vm2, %v854_v44, -inf }
 0x64b   :  { %861 = vmax.xlane.f32.xlu1 %v860_v47  ;;  %v857_v48 = vsel %vm266_vm2, %v849_v46, -inf }
 0x64c   :  { %858 = vmax.xlane.f32.xlu0 %v857_v48 }
 0x6d0   :  { %v657_v49 = vpop.xlane.xlu0 %656 }
 0x6d1   :  { %v659_v50 = vsub.f32 %v649_v36, %v657_v49  ;;  %v654_v51 = vpop.xlane.xlu1 %653 }
 0x6d2   :  { %v658_v52 = vsub.f32 %v644_v38, %v654_v51 }
 0x6d3   :  { %v662_v53 = vmul.f32 1.442695, %v659_v50 }
 0x6d4   :  { %v660_v54 = vmul.f32 1.442695, %v658_v52 }
 0x6d5   :  { %1629 = vpow2.f32 %v662_v53 }
 0x6d6   :  { %1631 = vpow2.f32 %v660_v54  ;;  %v1176_v54 = vld [vmem:[%s2001_s2] sm:$0xff] }
 0x6d8   :  { %v862_v55 = vpop.xlane.xlu1 %861 }
 0x6d9   :  { %v864_v56 = vsub.f32 %v854_v44, %v862_v55  ;;  %v859_v58 = vpop.xlane.xlu0 %858  ;;  %v1177_v55 = vld [vmem:[%s2001_s2 + $0x8] sm:$0xff] }
 0x6da   :  { %v863_v61 = vsub.f32 %v849_v46, %v859_v58  ;;  %v1178_v58 = vld [vmem:[%s2001_s2 + $0x10] sm:$0xff] }
 0x6db   :  { %v867_v62 = vmul.f32 1.442695, %v864_v56  ;;  %v1574_v56 = vpack.c.bf16 %v1177_v55, %v1176_v54 }
 0x6dc   :  { %v865_v63 = vmul.f32 1.442695, %v863_v61  ;;  %v1179_v61 = vld [vmem:[%s2001_s2 + $0x18] sm:$0xff]  ;;  %s1715_s2 = smov [#allocation6]  }
 0x6dd   :  { %1633 = vpow2.f32 %v867_v62  ;;  %v1580_v62 = vpack.c.bf16 %v1179_v61, %v1178_v58  ;;  %s1280_s1 = sshll.u32 %s1715_s2, 4  ;;  %s1281_s1 = int_to_ptr.vmem [resolvable:$true] %s1280_s1 }
 0x6de   :  { %1635 = vpow2.f32 %v865_v63  ;;  %s1675_s20 = scalar_lea.vmem %s1281_s1, 256  ;;  %p1680_p9 = scmp.lt.s32.totalorder %s1281_s1, %s1281_s1 }
 0x6df   :  { %v1630_v1 = vpop.eup %1629  ;;  %p1676_p8 = scmp.ne.s32.totalorder %s1281_s1, %s1675_s20  ;;  %p1681_p10 = scmp.lt.s32.totalorder %s1675_s20, %s1675_s20 }
 0x6e0   :  { %v1632_v2 = vpop.eup %1631  ;;  %v667_v3 = vsel %vm266_vm2, %v1630_v1, 0.0 }
 0x6e1   :  { %668 = vadd.xlane.f32.xlu1 %v667_v3  ;;  %v664_v4 = vsel %vm266_vm2, %v1632_v2, 0.0  ;;  %p1682_p11 = por %p1681_p10, %p1680_p9 }
 0x6e2   :  { %665 = vadd.xlane.f32.xlu0 %v664_v4 }
 0x6e3   :  { %p1683_p12 = pnand %p1682_p11, %p1676_p8 }
 0x6e7   :  { %v1634_v5 = vpop.eup %1633 }
 0x6e8   :  { %v1636_v6 = vpop.eup %1635  ;;  %v872_v7 = vsel %vm266_vm2, %v1634_v5, 0.0 }
 0x6e9   :  { %873 = vadd.xlane.f32.xlu1 %v872_v7  ;;  %v869_v8 = vsel %vm266_vm2, %v1636_v6, 0.0 }
 0x6ea   :  { %870 = vadd.xlane.f32.xlu0 %v869_v8 }
 0x6fa   :  { %977 = vrot.lane.b32.xlu1 %v1861_v42, %s1711_s30 }
 0x6fe   :  { %979 = vrot.lane.b32.xlu1 %v1859_v41, %s1711_s30 }
 0x700   :  { %1617 = vrot.lane.b32.xlu0 %v1852_v28, %s1712_s8 }
 0x76e   :  { %v669_v9 = vpop.xlane.xlu1 %668 }
 0x76f   :  { %1637 = vrcp.f32 %v669_v9  ;;  %v666_v10 = vpop.xlane.xlu0 %665 }
 0x770   :  { %1639 = vrcp.f32 %v666_v10 }
 0x776   :  { %v874_v11 = vpop.xlane.xlu1 %873 }
 0x777   :  { %1641 = vrcp.f32 %v874_v11  ;;  %v871_v12 = vpop.xlane.xlu0 %870 }
 0x778   :  { %1643 = vrcp.f32 %v871_v12 }
 0x779   :  { %v1638_v13 = vpop.eup %1637 }
 0x77a   :  { %v1640_v14 = vpop.eup %1639  ;;  %v673_v17 = vmul.f32 %v1638_v13, %v1630_v1  ;;  %v978_v22 = vpop.permute.xlu1 %977 }
 0x77b   :  { %v1618_v15 = vpop.permute.xlu0 %1617  ;;  %v671_v16 = vmul.f32 %v1640_v14, %v1632_v2 }
 0x77c   :  { %v1620_v18 = vunpack.i.h.bf16 %v1618_v15  ;;  %v1619_v42 = vunpack.i.l.bf16 %v1618_v15 }
 0x77d   :  { %1456 = vmatprep.mubr.msk.f32.mxu0 %vm266_vm2, %v671_v16 }
 0x77e   :  { %v1560_v41 = vpack.c.bf16 %v1620_v18, %v1619_v42  ;;  %1457 = vmatmul.mubr.msk.f32.vlgmr.msra.gmra.mrb[4].mxu0 %vm266_vm2, %v673_v17  ;;  %v980_v23 = vpop.permute.xlu1 %979 }
 0x780   :  { %1561 = vmatprep.subr.bf16.mxu0 %v1560_v41  ;;  %1571 = vmatprep.subr.bf16.mxu1 %v1560_v41 }
 0x781   :  { %v1642_v28 = vpop.eup %1641  ;;  %1563 = vmatpush3.bf16.msra.mxu0 %v1560_v41  ;;  %1573 = vmatpush3.bf16.msra.mxu1 %v1560_v41 }
 0x782   :  { %v1644_v19 = vpop.eup %1643  ;;  %1566 = vmatprep.subr.msk.bf16.mxu0 %vm1868_vm4, %v1903_v29  ;;  %v878_v21 = vmul.f32 %v1642_v28, %v1634_v5  ;;  %1576 = vmatprep.subr.msk.bf16.mxu1 %vm1773_vm1, %v1574_v56 }
 0x783   :  { %v876_v20 = vmul.f32 %v1644_v19, %v1636_v6 }
 0x785   :  { %1470 = vmatprep.mubr.msk.f32.mxu0 %vm266_vm2, %v876_v20 }
 0x786   :  { %1471 = vmatmul.mubr.msk.f32.vlgmr.msra.gmra.mrb[6].mxu0 %vm266_vm2, %v878_v21 }
 0x787   :  { %1477 = vmatprep.mubr.msk.f32.mxu0 %vm372_vm3, %v978_v22 }
 0x78a   :  { %1569 = vmatpush3.bf16.xpose.msk.msra.mxu0 %vm1868_vm4, %v1903_v29 }
 0x791   :  { %1478 = vmatmul.mubr.msk.f32.vlgmr.msra.gmra.mrb[8].mxu0 %vm372_vm3, %v980_v23 }
 0x851   :  { %v1458_v24 = vpop.f32.mrb[4].mxu0 }
 0x852   :  { %v746_v25 = vpop.f32.mrb[5].mxu0 }
 0x859   :  { %v1472_v26 = vpop.f32.mrb[6].mxu0 }
 0x85a   :  { %v957_v27 = vpop.f32.mrb[7].mxu0 }
 0x864   :  { %v1479_v30 = vpop.f32.mrb[8].mxu0 }
 0x865   :  { %v1057_v31 = vadd.f32 %v1479_v30, %v1882_v59  ;;  %v1051_v32 = vpop.f32.mrb[9].mxu0 }
 0x866   :  { %v1052_v33 = vadd.f32 %v1051_v32, %v1884_v60 }
 0x867   :  { %v1063_v34 = vsel %vm266_vm2, %v1057_v31, -inf }
 0x868   :  { %1064 = vmax.xlane.f32.xlu1 %v1063_v34  ;;  %v1060_v35 = vsel %vm266_vm2, %v1052_v33, -inf }
 0x869   :  { %1061 = vmax.xlane.f32.xlu0 %v1060_v35 }
 0x879   :  { %757 = vrot.lane.b32.xlu1 %v746_v25, %s1703_s12 }
 0x87d   :  { %968 = vrot.lane.b32.xlu1 %v957_v27, %s1713_s9 }
 0x881   :  { %970 = vrot.lane.b32.xlu1 %v1472_v26, %s1713_s9 }
 0x8f5   :  { %v1065_v57 = vpop.xlane.xlu1 %1064 }
 0x8f6   :  { %v1067_v29 = vsub.f32 %v1057_v31, %v1065_v57  ;;  %v1062_v36 = vpop.xlane.xlu0 %1061 }
 0x8f7   :  { %v1066_v37 = vsub.f32 %v1052_v33, %v1062_v36 }
 0x8f8   :  { %v1070_v59 = vmul.f32 1.442695, %v1067_v29 }
 0x8f9   :  { %v1068_v38 = vmul.f32 1.442695, %v1066_v37  ;;  %v758_v39 = vpop.permute.xlu1 %757 }
 0x8fa   :  { %764 = vst.msk [vmem:[#allocation2] sm:$0xff] %vm763_vm5, %v758_v39 }
 0x8fb   :  { %1645 = vpow2.f32 %v1068_v38 }
 0x8fc   :  { %1647 = vpow2.f32 %v1070_v59 }
 0x8fd   :  { %v969_v60 = vpop.permute.xlu1 %968 }
 0x8fe   :  { %975 = vst.msk [vmem:[#allocation2] sm:$0xff] %vm974_vm6, %v969_v60 }
 0x901   :  { %v971_v49 = vpop.permute.xlu1 %970 }
 0x905   :  { %v1646_v40 = vpop.eup %1645 }
 0x906   :  { %v1072_v43 = vsel %vm266_vm2, %v1646_v40, 0.0  ;;  %v1648_v44 = vpop.eup %1647 }
 0x907   :  { %1073 = vadd.xlane.f32.xlu0 %v1072_v43  ;;  %v1075_v45 = vsel %vm266_vm2, %v1648_v44, 0.0 }
 0x90b   :  { %1076 = vadd.xlane.f32.xlu0 %v1075_v45 }
 0x921   :  { %759 = vrot.lane.b32.xlu0 %v1458_v24, %s1703_s12 }
 0x994   :  { %v1074_v46 = vpop.xlane.xlu0 %1073 }
 0x995   :  { %1649 = vrcp.f32 %v1074_v46 }
 0x998   :  { %v1077_v47 = vpop.xlane.xlu0 %1076 }
 0x999   :  { %1651 = vrcp.f32 %v1077_v47 }
 0x99c   :  { %v760_v48 = vpop.permute.xlu0 %759 }
 0x99d   :  { %765 = vst.msk [vmem:[#allocation2 + $0x8] sm:$0xff] %vm763_vm5, %v760_v48 }
 0x99e   :  { %976 = vst.msk [vmem:[#allocation2 + $0x8] sm:$0xff] %vm974_vm6, %v971_v49 }
 0x99f   :  { %v1650_v50 = vpop.eup %1649 }
 0x9a0   :  { %v1079_v51 = vmul.f32 %v1650_v50, %v1646_v40 }
 0x9a2   :  { %1484 = vmatprep.mubr.msk.f32.mxu1 %vm266_vm2, %v1079_v51 }
 0x9a3   :  { %v1652_v52 = vpop.eup %1651 }
 0x9a4   :  { %v1081_v53 = vmul.f32 %v1652_v52, %v1648_v44 }
 0x9a6   :  { %1485 = vmatmul.mubr.msk.f32.vlgmr.msra.gmra.mrb[10].mxu1 %vm266_vm2, %v1081_v53 }
 0x9a7   :  { %1579 = vmatpush3.bf16.xpose.msk.msra.mxu1 %vm1773_vm1, %v1574_v56 }
 0x9a8   :  { %1582 = vmatprep.subr.msk.bf16.mxu1 %vm1773_vm1, %v1580_v62 }
 0x9af   :  { %1585 = vmatpush3.bf16.xpose.msk.msra.mxu1 %vm1773_vm1, %v1580_v62 }
 0xa79   :  { %v1486_v63 = vpop.f32.mrb[10].mxu1 }
 0xa7a   :  { %1167 = vrot.lane.b32.xlu1 %v1486_v63, %s1714_s19  ;;  %v1154_v1 = vpop.f32.mrb[11].mxu1 }
 0xa7b   :  { %1165 = vrot.lane.b32.xlu0 %v1154_v1, %s1714_s19 }
 0xaec   :  { %v1168_v2 = vpop.permute.xlu1 %1167 }
 0xaed   :  { %1173 = vst.msk [vmem:[#allocation2 + $0x8] sm:$0xff] %vm1171_vm7, %v1168_v2  ;;  %v1166_v3 = vpop.permute.xlu0 %1165 }
 0xaee   :  { %1172 = vst.msk [vmem:[#allocation2] sm:$0xff] %vm1171_vm7, %v1166_v3 }
 0xaf4   :  { %v1175_v5 = vld [vmem:[#allocation2 + $0x8] sm:$0xff] }
 0xaf5   :  { %v1174_v4 = vld [vmem:[#allocation2] sm:$0xff] }
 0xaf6   :  { %1495 = vmatprep.mubr.msk.f32.mxu1 %vm51_vm0, %v1174_v4 }
 0xaf7   :  { %1496 = vmatmul.mubr.msk.f32.vlgmr.msra.gmra.mrb[12].mxu1 %vm51_vm0, %v1175_v5 }
 0xbca   :  { %v1497_v0 = vpop.f32.mrb[12].mxu1 }
 0xbcb   :  { %1274 = vst.msk [vmem:[#allocation6 + $0x8] sm:$0xff] %vm51_vm0, %v1497_v0  ;;  %v1264_v6 = vpop.f32.mrb[13].mxu1 }
 0xbcc   :  { %1273 = vst.msk [vmem:[#allocation6] sm:$0xff] %vm51_vm0, %v1264_v6 }
 0xbcd   :  { %1686 = shalt.err (!%p1683_p12)
}
 0xbce   :  { %s1687_s22 = scalar_lea.hbm %s2006_s7, 256 }
 0xbcf   :  { %p1688_p13 = scmp.ne.s32.totalorder %s2006_s7, %s1687_s22  ;;  %p1691_p0 = scmp.lt.u32.totalorder %s1687_s22, %s2006_s7 }
 0xbd1   :  { %p1693_p1 = pnand %p1691_p0, %p1688_p13 }
 0xbd3   :  { %1696 = shalt.err (!%p1693_p1)
}
 0xbd4   :  { %1286 = dma.vmem_to_hbm [thread:$0]  %s1281_s1, 256, %s2006_s7, [#allocation5], %s1702_s11, %s1702_s11, %s1703_s12  }
 0xbd5   :  { %1699 = dma.done.wait [#allocation5], 256  }
 0xbd6   :  { %1700 = vsyncadd [#allocation5], 4294967040 }
 0xbd7   :  { %1290 = vsyncpa [#allocation4], 1 }
 0xbd8   :  { %1291 = vsyncpa [#allocation5], 1 }

</bundles_post_ra>
